<compile_context>
chip_gen: v7x
topology: tpu7x:2x2x1
jax: 0.10.0
libtpu: 0.0.40
codegen_flags: <defaults>
</compile_context>

<pallas_src>
import functools
import math

import numpy as np
import jax
import jax.numpy as jnp
from jax.experimental import pallas as pl
from jax.experimental.pallas import tpu as pltpu


# ----------------------------------------------------------------------------
# Deterministic parameter construction (mirrors AdaptiveWindowing.__init__).
# ----------------------------------------------------------------------------
def build_window_table(sample_rate, fft_size, f0_floor, f0_ceil):
    """Window buffer of shape (f0_ceil + 1, fft_size); rows < f0_floor stay 0."""
    table = np.zeros((f0_ceil + 1, fft_size), dtype=np.float32)
    for f0 in range(f0_floor, f0_ceil + 1):
        half_win_len = round(1.5 * sample_rate / f0)
        base_index = np.arange(-half_win_len, half_win_len + 1, dtype=np.int64)
        position = base_index / 1.5 / sample_rate
        left = fft_size // 2 - half_win_len
        right = fft_size // 2 + half_win_len + 1
        window = np.zeros(fft_size, dtype=np.float64)
        window[left:right] = 0.5 * np.cos(math.pi * position * f0) + 0.5
        average = np.sqrt(np.sum(window * window))
        table[f0] = (window / average).astype(np.float32)
    return table


def _round_up(x, m):
    return ((x + m - 1) // m) * m


@functools.lru_cache(maxsize=None)
def _fused_rdft_basis(fft_size, k_pad):
    """Fused real-DFT basis (N, 2*K_pad) bf16: [cos | -sin], zero-padded to K_pad."""
    n = np.arange(fft_size, dtype=np.float64)[:, None]
    k = np.arange(fft_size // 2 + 1, dtype=np.float64)[None, :]
    ang = 2.0 * np.pi * n * k / fft_size
    K = fft_size // 2 + 1
    basis = np.zeros((fft_size, 2 * k_pad), dtype=np.float32)
    basis[:, :K] = np.cos(ang)
    basis[:, k_pad:k_pad + K] = -np.sin(ang)
    # TODO(synk): on v7x an fp8 basis (values in [-1,1]) would halve the dominant
    # VMEM resident; gate behind an accuracy check at the production fft_size.
    return jnp.asarray(basis, dtype=jnp.bfloat16)


def _vmem_capacity_bytes(default=64 * 1024 * 1024):
    """Per-core VMEM capacity; conservative 64 MiB fallback works on all gens."""
    try:
        return int(pltpu.get_tpu_info().vmem_capacity_bytes)
    except Exception:
        return default


def _vmem_estimate(Tt, Nc, K_pad, F_pad):
    """Rough VMEM bytes for one grid step (constants counted single-buffered)."""
    f32, bf16, dbl = 4, 2, 2
    return (dbl * Tt * Nc * bf16            # frames blocks (bf16, double-buffered)
            + dbl * Tt * 128 * 4            # f0-id blocks ((Tt,1) lane-padded)
            + dbl * Tt * K_pad * f32        # output blocks
            + F_pad * Nc * bf16             # window table (single-buffered const)
            + Nc * 2 * K_pad * bf16         # fused DFT basis (single-buffered const)
            + Tt * 2 * K_pad * f32          # re/im accumulator scratch
            + Tt * F_pad * bf16             # one-hot temp
            + Tt * Nc * (f32 + bf16)        # win / y temps
            + Tt * 2 * K_pad * f32)         # magnitude temps


def _choose_tiling(Tp, N, K_pad, F_pad, budget, num_n_chunks=None):
    """Pick (frame tile Tt, number of N chunks): biggest Tt, fewest chunks."""
    max_tt = max(16, _round_up(Tp, 16))
    if N % 128 == 0:
        chunk_opts = [c for c in (1, 2, 4, 8, 16, 32)
                      if N % c == 0 and (N // c) % 128 == 0]
    else:
        chunk_opts = [1]                   # small / odd N: full-extent block only
    if num_n_chunks is not None:
        assert num_n_chunks in chunk_opts, "N chunk size must stay a 128-multiple"
        chunk_opts = [num_n_chunks]
    for Tt in (512, 384, 256, 128, 64, 32, 16):
        if Tt > max_tt:
            continue
        for nc in chunk_opts:
            if _vmem_estimate(Tt, N // nc, K_pad, F_pad) <= budget:
                return Tt, nc
    return 16, chunk_opts[-1]


def _const_spec(block_shape, index_map):
    """Single-buffer constant operands (their index_map is grid-invariant)."""
    try:
        return pl.BlockSpec(block_shape, index_map, pipeline_mode=pl.Buffered(1))
    except (AttributeError, TypeError):    # older jax: fall back to default
        return pl.BlockSpec(block_shape, index_map)


# ----------------------------------------------------------------------------
# Pallas kernel: one (Tt, Nc) frame chunk -> accumulate one (Tt, K_pad) spectrum.
# ----------------------------------------------------------------------------
def _adaptive_windowing_kernel(f_ref, frames_ref, table_ref, basis_ref, out_ref,
                               acc_ref, *, power, k_pad):
    k = pl.program_id(2)

    @pl.when(k == 0)
    def _():
        acc_ref[...] = jnp.zeros_like(acc_ref)

    Tt = frames_ref.shape[0]
    F_pad = table_ref.shape[0]

    # F0-adaptive window gather as a one-hot matmul on the MXU; ids outside
    # [0, F_pad) (unvoiced / padded frames) yield an all-zero window row, so the
    # gathered (Tt, N) windows never touch HBM.
    f_ids = f_ref[...]                                                    # (Tt, 1) i32
    onehot = (jax.lax.broadcasted_iota(jnp.int32, (Tt, F_pad), 1)
              == f_ids).astype(jnp.bfloat16)                              # (Tt, F_pad)
    win = jnp.dot(onehot, table_ref[...],
                  preferred_element_type=jnp.float32)                     # (Tt, Nc)

    # Elementwise adaptive windowing (VPU); bf16 for the MXU DFT pass.
    # TODO(synk): keep y in f32 (multi-pass MXU) if production fft_size needs
    # tighter accuracy than bf16-in / f32-accumulate gives.
    y = (frames_ref[...].astype(jnp.float32) * win).astype(jnp.bfloat16)  # (Tt, Nc)

    # rFFT as a fused real-DFT matmul against the [cos | -sin] basis chunk,
    # accumulated over N chunks in f32.
    # TODO(synk): no FFT primitive in Pallas; exact O(N^2) real-DFT used instead.
    acc_ref[...] += jnp.dot(y, basis_ref[...],
                            preferred_element_type=jnp.float32)           # (Tt, 2*K_pad)

    @pl.when(k == pl.num_programs(2) - 1)
    def _():
        re = acc_ref[:, :k_pad]
        im = acc_ref[:, k_pad:]
        mag2 = re * re + im * im
        out_ref[...] = mag2 if power else jnp.sqrt(mag2)


def adaptive_windowing(x, f, window_table, *, hop_size, fft_size, f0_floor=0,
                       power=False, padded_output=False, num_n_chunks=None,
                       vmem_limit_bytes=None):
    """Forward pass of AdaptiveWindowing.

    Args:
      x:            waveform, float32 (B, S), S = hop_size * T'
      f:            F0 sequence, int (B, T'), values in [0, f0_ceil]
      window_table: (f0_ceil + 1, fft_size) float32 window buffer
      f0_floor:     rows of window_table below f0_floor are all-zero; used to
                    shrink the one-hot gather contraction.
    Returns:
      (B, T', fft_size // 2 + 1) magnitude (or power) spectrogram, float32.
      With padded_output=True the raw (B, Tp_pad, K_pad) lane-dense array is
      returned instead (no HBM re-slice).
    """
    B, S = x.shape
    _, Tp = f.shape
    N = fft_size
    K = N // 2 + 1
    K_pad = _round_up(K, 128)
    assert S == hop_size * Tp, "waveform length must be hop_size * T'"

    # Window table shifted by f0_floor and padded to a 128-multiple of rows:
    # smaller, MXU-aligned one-hot contraction; bf16, resident in VMEM.
    table = window_table[f0_floor:].astype(jnp.bfloat16)
    F = table.shape[0]
    F_pad = _round_up(max(F, 1), 128)
    table = jnp.pad(table, ((0, F_pad - F), (0, 0)))

    # --- generation-aware VMEM budgeting ---
    cap = _vmem_capacity_bytes()
    if vmem_limit_bytes is None:
        vmem_limit_bytes = min(int(cap * 0.85), cap - (4 << 20))
    budget = int(vmem_limit_bytes * 0.85)
    Tt, n_chunks = _choose_tiling(Tp, N, K_pad, F_pad, budget, num_n_chunks)
    Nc = N // n_chunks

    # --- glue: zero pad + frame (== ConstantPad2d + unfold(...)[:, :-1, :]) ---
    pad = N // 2
    xp = jnp.pad(x.astype(jnp.float32), ((0, 0), (pad, pad))).astype(jnp.bfloat16)
    frame_idx = (jnp.arange(Tp)[:, None] * hop_size
                 + jnp.arange(N)[None, :])                   # (T', N)
    frames = xp[:, frame_idx]                                # (B, T', N) bf16
    # TODO(synk): overlapping-frame assembly is still an XLA gather in HBM; an
    # in-kernel manual-DMA framing from the waveform span would cut HBM reads by
    # a further ~N/hop_size but is not expressible with plain Blocked BlockSpecs.

    # --- tile the frame axis ---
    Tp_pad = _round_up(Tp, Tt)
    if Tp_pad != Tp:
        frames = jnp.pad(frames, ((0, 0), (0, Tp_pad - Tp), (0, 0)))
        f = jnp.pad(f, ((0, 0), (0, Tp_pad - Tp)))
    f_ids = (f.astype(jnp.int32) - f0_floor)[:, :, None]     # (B, Tp_pad, 1)

    basis = _fused_rdft_basis(N, K_pad)                      # (N, 2*K_pad) bf16, cached

    if n_chunks == 1:   # constant operands -> single VMEM buffer
        table_spec = _const_spec((F_pad, Nc), lambda b, t, k: (0, k))
        basis_spec = _const_spec((Nc, 2 * K_pad), lambda b, t, k: (k, 0))
    else:               # streamed over N chunks -> keep default double-buffering
        table_spec = pl.BlockSpec((F_pad, Nc), lambda b, t, k: (0, k))
        basis_spec = pl.BlockSpec((Nc, 2 * K_pad), lambda b, t, k: (k, 0))

    kernel = functools.partial(_adaptive_windowing_kernel, power=power, k_pad=K_pad)

    out = pl.pallas_call(
        kernel,
        out_shape=jax.ShapeDtypeStruct((B, Tp_pad, K_pad), jnp.float32),
        grid_spec=pltpu.PrefetchScalarGridSpec(
            num_scalar_prefetch=0,
            grid=(B, Tp_pad // Tt, n_chunks),
            in_specs=[
                pl.BlockSpec((None, Tt, 1), lambda b, t, k: (b, t, 0)),   # F0 ids
                pl.BlockSpec((None, Tt, Nc), lambda b, t, k: (b, t, k)),  # frames
                table_spec,                                               # window table
                basis_spec,                                               # cos|sin basis
            ],
            out_specs=pl.BlockSpec((None, Tt, K_pad), lambda b, t, k: (b, t, 0)),
            scratch_shapes=[pltpu.VMEM((Tt, 2 * K_pad), jnp.float32)],
        ),
        compiler_params=pltpu.CompilerParams(
            dimension_semantics=("parallel", "parallel", "arbitrary"),
            vmem_limit_bytes=int(vmem_limit_bytes)),
    )(f_ids, frames, table, basis)

    if padded_output:
        return out            # valid region is out[:, :Tp, :K]
    return out[:, :Tp, :K]


# ----------------------------------------------------------------------------
# Demo / correctness check.
# ----------------------------------------------------------------------------
if __name__ == "__main__":
    SAMPLE_RATE = 2000
    HOP_SIZE = 16
    F0_FLOOR = 50
    F0_CEIL = 120
    B, TP = 2, 8
    S = HOP_SIZE * TP

    key = jax.random.PRNGKey(0)
    kx, kf = jax.random.split(key)
    x = jax.random.normal(kx, (B, S), dtype=jnp.float32)
    f = jax.random.randint(kf, (B, TP), F0_FLOOR, F0_CEIL + 1).astype(jnp.int32)
    f = f.at[0, 0].set(0)                  # an "unvoiced" frame -> all-zero window

    def reference(x, f, table, fft_size):
        # pad -> unfold -> window gather -> rfft -> abs (pure-JAX torch mirror)
        pad = fft_size // 2
        xp = jnp.pad(x, ((0, 0), (pad, pad)))
        idx = jnp.arange(TP)[:, None] * HOP_SIZE + jnp.arange(fft_size)[None, :]
        frames = xp[:, idx]
        return jnp.abs(jnp.fft.rfft(frames * table[f], axis=-1))

    # --- config A: fft_size=128 (single N chunk, single-buffered constants) ---
    FFT_A = 128
    tbl_a = jnp.asarray(build_window_table(SAMPLE_RATE, FFT_A, F0_FLOOR, F0_CEIL))
    out_mag = jax.block_until_ready(adaptive_windowing(
        x, f, tbl_a, hop_size=HOP_SIZE, fft_size=FFT_A, f0_floor=F0_FLOOR,
        power=False))
    out_pow = jax.block_until_ready(adaptive_windowing(
        x, f, tbl_a, hop_size=HOP_SIZE, fft_size=FFT_A, f0_floor=F0_FLOOR,
        power=True))
    ref_a = reference(x, f, tbl_a, FFT_A)
    np.testing.assert_allclose(np.asarray(out_mag), np.asarray(ref_a),
                               rtol=5e-2, atol=2e-2)
    np.testing.assert_allclose(np.asarray(out_pow), np.asarray(ref_a) ** 2,
                               rtol=7e-2, atol=2e-2)

    # --- config B: fft_size=256, forced 2-chunk contraction (accumulator path) ---
    FFT_B = 256
    tbl_b = jnp.asarray(build_window_table(SAMPLE_RATE, FFT_B, F0_FLOOR, F0_CEIL))
    out_b = jax.block_until_ready(adaptive_windowing(
        x, f, tbl_b, hop_size=HOP_SIZE, fft_size=FFT_B, f0_floor=F0_FLOOR,
        power=False, num_n_chunks=2))
    ref_b = reference(x, f, tbl_b, FFT_B)
    np.testing.assert_allclose(np.asarray(out_b), np.asarray(ref_b),
                               rtol=5e-2, atol=3e-2)

    print("KERNEL_OK")
</pallas_src>

<mosaic_0001>
module attributes {stable_mosaic.version = 11 : i64} {
  func.func @_adaptive_windowing_kernel(%arg0: i32, %arg1: i32, %arg2: i32, %arg3: memref<1x16x1xi32, #tpu.memory_space<vmem>>, %arg4: memref<1x16x128xbf16, #tpu.memory_space<vmem>>, %arg5: memref<128x128xbf16, #tpu.memory_space<vmem>>, %arg6: memref<128x256xbf16, #tpu.memory_space<vmem>>, %arg7: memref<1x16x128xf32, #tpu.memory_space<vmem>>, %arg8: memref<16x256xf32, #tpu.memory_space<vmem>>) attributes {dimension_semantics = [#tpu.dimension_semantics<parallel>, #tpu.dimension_semantics<parallel>, #tpu.dimension_semantics<arbitrary>], iteration_bounds = array<i64: 2, 1, 1>, scalar_prefetch = 0 : i64, scratch_operands = 1 : i64, tpu.core_type = #tpu.core_type<tc>, window_params = [{transform_indices = @transform_0, window_bounds = array<i64: 1, 16, 1>}, {transform_indices = @transform_1, window_bounds = array<i64: 1, 16, 128>}, {pipeline_mode = #tpu.pipeline_mode<synchronous>, transform_indices = @transform_2, window_bounds = array<i64: 128, 128>}, {pipeline_mode = #tpu.pipeline_mode<synchronous>, transform_indices = @transform_3, window_bounds = array<i64: 128, 256>}, {transform_indices = @transform_4, window_bounds = array<i64: 1, 16, 128>}]} {
    %c0_i32 = arith.constant 0 : i32
    %0 = arith.cmpi eq, %arg2, %c0_i32 : i32
    %1 = arith.extui %0 : i1 to i32
    %c0_i32_0 = arith.constant 0 : i32
    %2 = arith.cmpi ne, %1, %c0_i32_0 : i32
    scf.if %2 {
      %cst_17 = arith.constant 0.000000e+00 : f32
      %26 = vector.broadcast %cst_17 : f32 to vector<16x256xf32>
      %c0_18 = arith.constant 0 : index
      %c0_19 = arith.constant 0 : index
      %27 = vector.load %arg8[%c0_18, %c0_19] : memref<16x256xf32, #tpu.memory_space<vmem>>, vector<16x256xf32>
      tpu.vector_store %arg8[%c0_18, %c0_19], %26 {strides = array<i32>} : memref<16x256xf32, #tpu.memory_space<vmem>>, vector<16x256xf32>,
    } else {
    }
    %c0 = arith.constant 0 : index
    %c0_1 = arith.constant 0 : index
    %c0_2 = arith.constant 0 : index
    %3 = vector.load %arg3[%c0, %c0_1, %c0_2] : memref<1x16x1xi32, #tpu.memory_space<vmem>>, vector<1x16x1xi32>
    %4 = vector.shape_cast %3 : vector<1x16x1xi32> to vector<16x1xi32>
    %5 = tpu.iota {dimensions = array<i32: 1>} : vector<16x128xi32>
    %6 = vector.broadcast %4 : vector<16x1xi32> to vector<16x128xi32>
    %7 = arith.cmpi eq, %5, %6 : vector<16x128xi32>
    %8 = arith.extui %7 : vector<16x128xi1> to vector<16x128xi32>
    %9 = arith.sitofp %8 : vector<16x128xi32> to vector<16x128xf32>
    %10 = arith.truncf %9 : vector<16x128xf32> to vector<16x128xbf16>
    %c0_3 = arith.constant 0 : index
    %c0_4 = arith.constant 0 : index
    %11 = vector.load %arg5[%c0_3, %c0_4] : memref<128x128xbf16, #tpu.memory_space<vmem>>, vector<128x128xbf16>
    %cst = arith.constant dense<0.000000e+00> : vector<16x128xf32>
    %12 = tpu.matmul %10, %11, %cst {dimension_numbers = #tpu.dot_dimension_numbers<[1], [0], [0], [1], [0, 0, 1, 1], [], []>} : vector<16x128xbf16>, vector<128x128xbf16>, vector<16x128xf32> -> vector<16x128xf32>
    %c0_5 = arith.constant 0 : index
    %c0_6 = arith.constant 0 : index
    %c0_7 = arith.constant 0 : index
    %13 = vector.load %arg4[%c0_5, %c0_6, %c0_7] : memref<1x16x128xbf16, #tpu.memory_space<vmem>>, vector<1x16x128xbf16>
    %14 = vector.shape_cast %13 : vector<1x16x128xbf16> to vector<16x128xbf16>
    %15 = arith.extf %14 : vector<16x128xbf16> to vector<16x128xf32>
    %16 = arith.mulf %15, %12 : vector<16x128xf32>
    %17 = arith.truncf %16 : vector<16x128xf32> to vector<16x128xbf16>
    %c0_8 = arith.constant 0 : index
    %c0_9 = arith.constant 0 : index
    %18 = vector.load %arg8[%c0_8, %c0_9] : memref<16x256xf32, #tpu.memory_space<vmem>>, vector<16x256xf32>
    %c0_10 = arith.constant 0 : index
    %c0_11 = arith.constant 0 : index
    %19 = vector.load %arg6[%c0_10, %c0_11] : memref<128x256xbf16, #tpu.memory_space<vmem>>, vector<128x256xbf16>
    %cst_12 = arith.constant dense<0.000000e+00> : vector<16x256xf32>
    %20 = tpu.matmul %17, %19, %cst_12 {dimension_numbers = #tpu.dot_dimension_numbers<[1], [0], [0], [1], [0, 0, 1, 1], [], []>} : vector<16x128xbf16>, vector<128x256xbf16>, vector<16x256xf32> -> vector<16x256xf32>
    %21 = arith.addf %18, %20 : vector<16x256xf32>
    %c0_13 = arith.constant 0 : index
    %c0_14 = arith.constant 0 : index
    %22 = vector.load %arg8[%c0_13, %c0_14] : memref<16x256xf32, #tpu.memory_space<vmem>>, vector<16x256xf32>
    tpu.vector_store %arg8[%c0_13, %c0_14], %21 {strides = array<i32>} : memref<16x256xf32, #tpu.memory_space<vmem>>, vector<16x256xf32>,
    %c0_i32_15 = arith.constant 0 : i32
    %23 = arith.cmpi eq, %arg2, %c0_i32_15 : i32
    %24 = arith.extui %23 : i1 to i32
    %c0_i32_16 = arith.constant 0 : i32
    %25 = arith.cmpi ne, %24, %c0_i32_16 : i32
    scf.if %25 {
      %c0_17 = arith.constant 0 : index
      %c0_18 = arith.constant 0 : index
      %26 = vector.load %arg8[%c0_17, %c0_18] : memref<16x256xf32, #tpu.memory_space<vmem>>, vector<16x128xf32>
      %c0_19 = arith.constant 0 : index
      %c128 = arith.constant 128 : index
      %27 = vector.load %arg8[%c0_19, %c128] : memref<16x256xf32, #tpu.memory_space<vmem>>, vector<16x128xf32>
      %28 = arith.mulf %26, %26 : vector<16x128xf32>
      %29 = arith.mulf %27, %27 : vector<16x128xf32>
      %30 = arith.addf %28, %29 : vector<16x128xf32>
      %31 = math.sqrt %30 : vector<16x128xf32>
      %c0_20 = arith.constant 0 : index
      %c0_21 = arith.constant 0 : index
      %c0_22 = arith.constant 0 : index
      %32 = vector.load %arg7[%c0_20, %c0_21, %c0_22] : memref<1x16x128xf32, #tpu.memory_space<vmem>>, vector<1x16x128xf32>
      %33 = vector.shape_cast %32 : vector<1x16x128xf32> to vector<16x128xf32>
      %34 = vector.shape_cast %31 : vector<16x128xf32> to vector<1x16x128xf32>
      tpu.vector_store %arg7[%c0_20, %c0_21, %c0_22], %34 {strides = array<i32>} : memref<1x16x128xf32, #tpu.memory_space<vmem>>, vector<1x16x128xf32>,
    } else {
    }
    return
  }
  func.func @transform_0(%arg0: i32, %arg1: i32, %arg2: i32) -> (i32, i32, i32) {
    %c0_i32 = arith.constant 0 : i32
    %c0_i32_0 = arith.constant 0 : i32
    return %arg0, %arg1, %c0_i32 : i32, i32, i32
  }
  func.func @transform_1(%arg0: i32, %arg1: i32, %arg2: i32) -> (i32, i32, i32) {
    %c0_i32 = arith.constant 0 : i32
    return %arg0, %arg1, %arg2 : i32, i32, i32
  }
  func.func @transform_2(%arg0: i32, %arg1: i32, %arg2: i32) -> (i32, i32) {
    %c0_i32 = arith.constant 0 : i32
    %c0_i32_0 = arith.constant 0 : i32
    return %c0_i32, %arg2 : i32, i32
  }
  func.func @transform_3(%arg0: i32, %arg1: i32, %arg2: i32) -> (i32, i32) {
    %c0_i32 = arith.constant 0 : i32
    %c0_i32_0 = arith.constant 0 : i32
    return %arg2, %c0_i32 : i32, i32
  }
  func.func @transform_4(%arg0: i32, %arg1: i32, %arg2: i32) -> (i32, i32, i32) {
    %c0_i32 = arith.constant 0 : i32
    %c0_i32_0 = arith.constant 0 : i32
    return %arg0, %arg1, %c0_i32 : i32, i32, i32
  }
}

</mosaic_0001>

<bundles_post_ra>
// kernel: tpu_custom_call.1
= control target key start
LH: loop header
LB: loop body
LE: loop exit
PB: predicated region body
PF: predicated region fallthrough
CT: control target
= control target key end

     0   :  { %9 = vsyncpa [#allocation4], 0  ;;  %s1376_s0 = inlined_call_operand.vmem [shape: s32[2,16,1], index: 0, kind: input, shape index: {}]   ;;  %s1377_s1 = inlined_call_operand.vmem [shape: bf16[2,16,128], index: 1, kind: input, shape index: {}]   ;;  %s1378_s2 = inlined_call_operand.hbm [shape: bf16[128,128], index: 2, kind: input, shape index: {}]   ;;  %s1379_s3 = inlined_call_operand.hbm [shape: bf16[128,256], index: 3, kind: input, shape index: {}]   ;;  %s1380_s4 = inlined_call_operand.hbm [shape: f32[2,16,128], index: 4, kind: output, shape index: {}]  }
   0x1   :  { %10 = vsyncpa [#allocation7], 0 }
   0x2   :  { %11 = vsyncpa [#allocation5], 0 }
   0x3   :  { %13 = vsyncpa [#allocation5 + $0x1], 0  ;;  %s1179_s15 = smov 0   ;;  %s1181_s16 = smov 0  }
   0x4   :  { %s1183_s17 = smov 0   ;;  %s1185_s18 = smov 0  }
   0x5   :  { %s1187_s19 = smov 0   ;;  %s1189_s20 = smov 0  }
   0x6 LB: > { %s791_s21 = sadd.s32 4294967295, %s1139_s20   ;;  %s792_s22 = sadd.s32 4294967294, %s1139_s20   ;;  %s1139_s20 = sphi %s1189_s20, %s19_s20   ;;  %s1135_s19 = sphi %s1187_s19, %s1398_s19   ;;  %s1131_s18 = sphi %s1185_s18, %s1397_s18   ;;  %s1127_s17 = sphi %s1183_s17, %s1396_s17   ;;  %s1123_s16 = sphi %s1181_s16, %s1395_s16   ;;  %s1119_s15 = sphi %s1179_s15, %s1394_s15  }
   0x7   : > { %s38_s23 = sadd.s32 1, %s1135_s19  ;;  %s157_s24 = sadd.s32 1, %s1127_s17 }
   0x8   : > { %p40_p0 = scmp.ge.s32.totalorder %s38_s23, 2  ;;  %p167_p1 = scmp.ne.s32.totalorder %s1127_s17, %s1123_s16 }
   0x9   : > { %p168_p2 = scmp.eq.s32.totalorder %s791_s21, 1  ;;  %p173_p3 = scmp.ne.s32.totalorder %s1123_s16, %s1119_s15 }
   0xa   : > { %s1400_s23 = smov (%p40_p0, %s38_s23), 0  ;;  %p174_p5 = scmp.eq.s32.totalorder %s792_s22, 1 }
   0xb   : > { %p1219_p4 = por %p168_p2, %p167_p1  ;;  %s152_s26 = ssub.s32 %s1135_s19, %s1400_s23 }
   0xc   : > { %p793_p6 = scmp.ge.s32.totalorder %s1139_s20, 1  ;;  %p155_p7 = scmp.eq.s32.totalorder %s152_s26, 0 }
   0xd   : > { %s1385_s25 = scalar_select %p1219_p4, 1, 0 }
   0xe   : > { %p1226_p8 = por %p174_p5, %p173_p3  ;;  %p181_p9 = scmp.lt.s32.totalorder %s1139_s20, 3 }
   0xf   : > { %s1232_s28 = scalar_select %p155_p7, %s1127_s17, %s157_s24  }
  0x10   : > { %s1386_s27 = scalar_select %p1226_p8, 1, 0 }
  0x11   : > { %p1234_p10 = pnand %p793_p6, %p181_p9  ;;  %p1238_p11 = scmp.eq.s32.totalorder %s791_s21, 0 }
  0x12   : > { %s1141_s5 = smov [#allocation3]   ;;  %s1142_s8 = smov [#allocation6]  }
  0x13   : > { %s1387_s29 = scalar_select %p1234_p10, 1, 0 }
  0x14   : > { %s1388_s30 = scalar_select %p1238_p11, 1, 0 }
  0x15   : > { %p884_p12 = pneg %p1234_p10  ;;  %s195_s6 = sshll.u32 %s1141_s5, 4  ;;  %s196_s6 = int_to_ptr.vmem [resolvable:$true] %s195_s6 }
  0x16   : > { %s212_s9 = sshll.u32 %s1142_s8, 4  ;;  %s997_s12 = scalar_lea.hbm %s1378_s2, 1024  ;;  %s1250_s9 = int_to_ptr.vmem [resolvable:$true] %s212_s9 }
  0x17   : > { %p1246_p13 = pnand %p1238_p11, %p884_p12  ;;  %p998_p0 = scmp.ne.s32.totalorder %s1378_s2, %s997_s12 }
  0x18   : > { %p1004_p5 = scmp.lt.u32.totalorder %s997_s12, %s1378_s2 }
  0x19   : > { %p999_p1 = pneg %p1246_p13 }
  0x1b   : > { %p1000_p2 = pnand %p999_p1, %p998_p0 }
  0x1d   : > { %p1001_p3 = pneg %p1000_p2 }
  0x1f   : > { %p1006_p6 = pnand %p1004_p5, %p1001_p3 }
  0x21   : > { %1009 = shalt.err (!%p1006_p6)
}
  0x22   : > { %s1010_s24 = scalar_lea.vmem %s196_s6, 1024  ;;  %p1018_p8 = scmp.lt.s32.totalorder %s196_s6, %s196_s6 }
  0x23   : > { %p1011_p7 = scmp.ne.s32.totalorder %s196_s6, %s1010_s24  ;;  %p1019_p4 = scmp.lt.s32.totalorder %s1010_s24, %s1010_s24 }
  0x25   : > { %p1013_p9 = pnand %p1011_p7, %p999_p1  ;;  %p1020_p11 = por %p1019_p4, %p1018_p8 }
  0x27   : > { %p1014_p12 = pneg %p1013_p9 }
  0x29   : > { %p1021_p10 = pnand %p1020_p11, %p1014_p12 }
  0x2b   : > { %1024 = shalt.err (!%p1021_p10)
}
  0x2c   : > { %s1143_s26 = smov 64   ;;  %s1144_s5 = smov 4  }
  0x2d   : > { %887 = dma.hbm_to_vmem [thread:$0]  (!%p1246_p13), %s1378_s2, 1024, %s196_s6, [#allocation4], %s1143_s26, %s1143_s26, %s1144_s5  }
  0x2e   : > { %s1025_s13 = scalar_lea.hbm %s1379_s3, 2048 }
  0x2f   : > { %p1026_p0 = scmp.ne.s32.totalorder %s1379_s3, %s1025_s13  ;;  %p1032_p10 = scmp.lt.u32.totalorder %s1025_s13, %s1379_s3 }
  0x31   : > { %p1028_p4 = pnand %p1026_p0, %p999_p1 }
  0x33   : > { %p1029_p8 = pneg %p1028_p4 }
  0x35   : > { %p1034_p11 = pnand %p1032_p10, %p1029_p8 }
  0x37   : > { %1037 = shalt.err (!%p1034_p11)
}
  0x38   : > { %s1038_s6 = scalar_lea.vmem %s1250_s9, 2048  ;;  %p1046_p6 = scmp.lt.s32.totalorder %s1250_s9, %s1250_s9 }
  0x39   : > { %p1039_p2 = scmp.ne.s32.totalorder %s1250_s9, %s1038_s6  ;;  %p1047_p7 = scmp.lt.s32.totalorder %s1038_s6, %s1038_s6 }
  0x3b   : > { %p1041_p3 = pnand %p1039_p2, %p999_p1  ;;  %p1048_p9 = por %p1047_p7, %p1046_p6 }
  0x3d   : > { %p1042_p5 = pneg %p1041_p3 }
  0x3f   : > { %p1049_p12 = pnand %p1048_p9, %p1042_p5 }
  0x41   : > { %1052 = shalt.err (!%p1049_p12)
}
  0x42   : > { %s1145_s26 = smov 128   ;;  %s1146_s5 = smov 8  }
  0x43   : > { %890 = dma.hbm_to_vmem [thread:$0]  (!%p1246_p13), %s1379_s3, 2048, %s1250_s9, [#allocation7], %s1145_s26, %s1145_s26, %s1146_s5  }
  0x44   : > { %p1390_p0 = scmp.ne.s32.totalorder %s1387_s29, 0 }
  0x45   : > { %p1391_p1 = scmp.ne.s32.totalorder (!%p1390_p0), %s1388_s30, 0 }
  0x46   : > { %257 = sbr.rel (%p1390_p0) target bundleno = 688 (0x2b0), region = 36 }
  0x4d   : > { %1106 = dma.done.wait (%p1391_p1), [#allocation4], 1024  }
  0x4e   : > { %1108 = vsyncadd (%p1391_p1), [#allocation4], 4294966272 }
  0x4f   : > { %1110 = dma.done.wait (%p1391_p1), [#allocation7], 2048  }
  0x50   : > { %1112 = vsyncadd (%p1391_p1), [#allocation7], 4294965248  ;;  %p304_p4 = scmp.lt.s32.totalorder %s1131_s18, 1  ;;  %v1147_v0 = vmov 0   ;;  %v1148_v1 = vmov 0.0   ;;  %v961_v3 = vld [vmem:[#allocation3] sm:$0xff]   ;;  %v339_v25 = vlaneseq }
  0x51   : > { %960 = vset.pattern.permute.xlu0 %v1147_v0  ;;  %854 = vmatprep.subr.bf16.mxu0 %v1148_v1  ;;  %v962_v5 = vld [vmem:[#allocation3 + $0x8] sm:$0xff]   ;;  %vm1149_vm0 = vmmov 0   ;;  %v963_v6 = vld [vmem:[#allocation3 + $0x10] sm:$0xff]   ;;  %v964_v10 = vld [vmem:[#allocation3 + $0x18] sm:$0xff]   ;;  %v1150_v29 = vmov 1.0|1.0  }
  0x52   : > { %s1311_s29 = scalar_select %p304_p4, %s1131_s18, 1  ;;  %598 = vmatprep.mubr.bf16.mxu1 %v1147_v0  ;;  %855 = vmatpush3.bf16.msra.mxu0 %v961_v3  ;;  %v969_v7 = vld [vmem:[#allocation6 + $0x4] ss:$8 sps:$4 sm:$0xff]   ;;  %v971_v8 = vld [vmem:[#allocation6] ss:$8 sps:$4 sm:$0xff]   ;;  %v967_v19 = vld [vmem:[#allocation3 + $0x30] sm:$0xff]  }
  0x53   : > { %856 = vmatprep.subr.bf16.mxu0 %v1148_v1  ;;  %870 = vmatprep.mubr.msk.bf16.mxu0 %vm1149_vm0, %v1148_v1  ;;  %v972_v9 = vld [vmem:[#allocation6 + $0x14] ss:$8 sps:$4 sm:$0xff]   ;;  %v974_v11 = vld [vmem:[#allocation6 + $0x10] ss:$8 sps:$4 sm:$0xff]   ;;  %v975_v12 = vld [vmem:[#allocation6 + $0x24] ss:$8 sps:$4 sm:$0xff]  }
  0x54   : > { %s838_s7 = sshll.u32 %s1311_s29, 4  ;;  %566 = vmatprep.subr.bf16.mxu1 %v969_v7  ;;  %v965_v13 = vld [vmem:[#allocation3 + $0x20] sm:$0xff]   ;;  %v978_v15 = vld [vmem:[#allocation6 + $0x34] ss:$8 sps:$4 sm:$0xff]   ;;  %v966_v16 = vld [vmem:[#allocation3 + $0x28] sm:$0xff]   ;;  %v340_v27 = vand.u32 127, %v339_v25 }
  0x55   : > { %s311_s12 = scalar_lea.vmem %s1376_s0, %s838_s7  ;;  %567 = vmatpush1.bf16.msra.mxu1 %v971_v8  ;;  %v977_v14 = vld [vmem:[#allocation6 + $0x20] ss:$8 sps:$4 sm:$0xff]   ;;  %v980_v17 = vld [vmem:[#allocation6 + $0x30] ss:$8 sps:$4 sm:$0xff]   ;;  %v981_v18 = vld [vmem:[#allocation6 + $0x44] ss:$8 sps:$4 sm:$0xff]  }
  0x56   : > { %v337_v2 = vld [vmem:[%s311_s12] sm:$0xff]  ;;  %v338_v4 = vld [vmem:[%s311_s12 + $0x8] sm:$0xff]  ;;  %857 = vmatpush3.bf16.msra.mxu0 %v962_v5  ;;  %568 = vmatprep.subr.bf16.mxu1 %v972_v9  ;;  %v983_v20 = vld [vmem:[#allocation6 + $0x40] ss:$8 sps:$4 sm:$0xff]   ;;  %s839_s30 = sshll.u32 %s1311_s29, 3  ;;  %s300_s22 = sand.u32 1, %s1123_s16  }
  0x57   : > { %342 = vperm.xlu0 %960, %v337_v2   ;;  %858 = vmatprep.subr.bf16.mxu0 %v1148_v1  ;;  %v984_v21 = vld [vmem:[#allocation6 + $0x54] ss:$8 sps:$4 sm:$0xff]   ;;  %v986_v23 = vld [vmem:[#allocation6 + $0x50] ss:$8 sps:$4 sm:$0xff]   ;;  %v987_v24 = vld [vmem:[#allocation6 + $0x64] ss:$8 sps:$4 sm:$0xff]   ;;  %s324_s21 = scalar_lea.vmem %s1377_s1, %s839_s30 }
  0x58   : > { %v968_v22 = vld [vmem:[#allocation3 + $0x38] sm:$0xff]   ;;  %v989_v30 = vld [vmem:[#allocation6 + $0x60] ss:$8 sps:$4 sm:$0xff]   ;;  %v842_v33 = vld [vmem:[%s324_s21] sm:$0xff]   ;;  %s800_s24 = sshll.u32 %s300_s22, 4  ;;  %s840_s6 = sshll.u32 %s1131_s18, 8 }
  0x59   : > { %569 = vmatpush1.bf16.msra.mxu1 %v974_v11  ;;  %v990_v31 = vld [vmem:[#allocation6 + $0x74] ss:$8 sps:$4 sm:$0xff]   ;;  %v992_v32 = vld [vmem:[#allocation6 + $0x70] ss:$8 sps:$4 sm:$0xff]   ;;  %v843_v34 = vunpack.c.l.bf16 %v842_v33  ;;  %v844_v35 = vunpack.c.h.bf16 %v842_v33  ;;  %s302_s26 = scalar_lea.vmem [#allocation8], %s800_s24  ;;  %s1326_s29 = scalar_lea.hbm %s1380_s4, %s840_s6 }
  0x5a   : > { %859 = vmatpush3.bf16.msra.mxu0 %v963_v6  ;;  %570 = vmatprep.subr.bf16.mxu1 %v975_v12  ;;  %s662_s5 = sshll.u32 %s302_s26, 4  ;;  %s1330_s18 = scalar_lea.sflag [#allocation5], %s300_s22  ;;  %s1328_s5 = int_to_ptr.vmem [resolvable:$true] %s662_s5 }
  0x5b   : > { %345 = vperm.xlu0 %960, %v338_v4   ;;  %860 = vmatprep.subr.bf16.mxu0 %v1148_v1  ;;  %s1053_s7 = scalar_lea.vmem %s1328_s5, 256  ;;  %p1392_p8 = scmp.ne.s32.totalorder %s1385_s25, 0 }
  0x5c   : > { %p1054_p13 = scmp.ne.s32.totalorder %s1328_s5, %s1053_s7  ;;  %s1151_s9 = smov [#allocation8]  }
  0x5d   : > { %571 = vmatpush1.bf16.msra.mxu1 %v977_v14  ;;  %s1057_s11 = sshll.u32 %s1151_s9, 4  ;;  %s1058_s11 = int_to_ptr.vmem [resolvable:$false] %s1057_s11 }
  0x5e   : > { %861 = vmatpush3.bf16.msra.mxu0 %v964_v10  ;;  %572 = vmatprep.subr.bf16.mxu1 %v978_v15  ;;  %p1055_p10 = pnand %p1054_p13, %p1392_p8  ;;  %s1059_s12 = scalar_lea.vmem %s1058_s11, 512 }
  0x5f   : > { %862 = vmatprep.subr.bf16.mxu0 %v1148_v1  ;;  %p1060_p2 = scmp.lt.s32.totalorder %s1328_s5, %s1058_s11  ;;  %p1061_p3 = scmp.lt.s32.totalorder %s1059_s12, %s1053_s7 }
  0x60   : > { %p1056_p11 = pneg %p1055_p10 }
  0x61   : > { %573 = vmatpush1.bf16.msra.mxu1 %v980_v17  ;;  %p1062_p5 = por %p1061_p3, %p1060_p2 }
  0x62   : > { %863 = vmatpush3.bf16.msra.mxu0 %v965_v13  ;;  %574 = vmatprep.subr.bf16.mxu1 %v981_v18 }
  0x63   : > { %864 = vmatprep.subr.bf16.mxu0 %v1148_v1  ;;  %p1063_p6 = pnand %p1062_p5, %p1056_p11 }
  0x65   : > { %575 = vmatpush1.bf16.msra.mxu1 %v983_v20 }
  0x66   : > { %865 = vmatpush3.bf16.msra.mxu0 %v966_v16  ;;  %576 = vmatprep.subr.bf16.mxu1 %v984_v21 }
  0x67   : > { %866 = vmatprep.subr.bf16.mxu0 %v1148_v1 }
  0x69   : > { %577 = vmatpush1.bf16.msra.mxu1 %v986_v23 }
  0x6a   : > { %867 = vmatpush3.bf16.msra.mxu0 %v967_v19  ;;  %578 = vmatprep.subr.bf16.mxu1 %v987_v24 }
  0x6b   : > { %868 = vmatprep.subr.bf16.mxu0 %v1148_v1 }
  0x6d   : > { %579 = vmatpush1.bf16.msra.mxu1 %v989_v30 }
  0x6e   : > { %869 = vmatpush3.bf16.msra.mxu0 %v968_v22  ;;  %580 = vmatprep.subr.bf16.mxu1 %v990_v31 }
  0x71   : > { %581 = vmatpush1.bf16.msra.mxu1 %v992_v32 }
  0xd6   : > { %v343_v26 = vpop.permute.xlu0 %342 }
  0xd7   : > { %vm347_vm1 = vcmp.eq.s32.totalorder %v340_v27, %v343_v26 }
  0xda   : > { %v346_v28 = vpop.permute.xlu0 %345 }
  0xdb   : > { %vm348_vm2 = vcmp.eq.s32.totalorder %v340_v27, %v346_v28 }
  0xdc   : > { %vm815_vm3 = vmpackc.low %vm348_vm2, %vm347_vm1 }
  0xdd   : > { %871 = vmatmul.mubr.msk.bf16.vlgmr.msra.gmra.mrb[0].mxu0 %vm815_vm3, %v1150_v29 }
 0x1b0   : > { %v452_v36 = vpop.f32.mrb[0].mxu0 }
 0x1b1   : > { %v463_v37 = vmul.f32 %v843_v34, %v452_v36  ;;  %v872_v38 = vpop.f32.mrb[1].mxu0 }
 0x1b2   : > { %v455_v39 = vpop.f32.mrb[2].mxu0 }
 0x1b3   : > { %v464_v40 = vmul.f32 %v844_v35, %v455_v39  ;;  %v873_v41 = vpop.f32.mrb[3].mxu0 }
 0x1b5   : > { %v465_v42 = vpack.c.bf16 %v464_v40, %v463_v37 }
 0x1b7   : > { %599 = vmatmul.mubr.bf16.vlgmr.msra.gmra.mrb[0].mxu1 %v465_v42 }
 0x28a   : > { %v600_v43 = vpop.f32.mrb[0].mxu1 }
 0x28b   : > { %v624_v44 = vmul.f32 %v600_v43, %v600_v43  ;;  %v602_v45 = vpop.f32.mrb[1].mxu1 }
 0x28c   : > { %v626_v46 = vmul.f32 %v602_v45, %v602_v45  ;;  %v604_v47 = vpop.f32.mrb[2].mxu1 }
 0x28d   : > { %v625_v48 = vmul.f32 %v604_v47, %v604_v47  ;;  %v606_v49 = vpop.f32.mrb[3].mxu1 }
 0x28e   : > { %v628_v50 = vadd.f32 %v626_v46, %v624_v44  ;;  %v627_v51 = vmul.f32 %v606_v49, %v606_v49 }
 0x290   : > { %993 = vrsqrt.f32 %v628_v50  ;;  %v629_v52 = vadd.f32 %v627_v51, %v625_v48  ;;  %vm632_vm4 = vcmp.eq.f32.partialorder %v628_v50, inf  ;;  %v635_v56 = vand.u32 2147483648, %v628_v50 }
 0x291   : > { %vm634_vm5 = vcmp.eq.f32.partialorder %v628_v50, 0.0 }
 0x292   : > { %995 = vrsqrt.f32 %v629_v52  ;;  %vm639_vm6 = vcmp.eq.f32.partialorder %v629_v52, inf  ;;  %v642_v59 = vand.u32 2147483648, %v629_v52  ;;  %vm641_vm7 = vcmp.eq.f32.partialorder %v629_v52, 0.0 }
 0x29a   : > { %v994_v53 = vpop.eup %993 }
 0x29b   : > { %v631_v54 = vmul.f32 %v994_v53, %v628_v50 }
 0x29c   : > { %v996_v55 = vpop.eup %995 }
 0x29d   : > { %v638_v57 = vmul.f32 %v996_v55, %v629_v52  ;;  %v633_v58 = vsel %vm632_vm4, %v628_v50, %v631_v54 }
 0x29e   : > { %v636_v60 = vsel %vm634_vm5, %v635_v56, %v633_v58 }
 0x29f   : > { %v640_v61 = vsel %vm639_vm6, %v629_v52, %v638_v57  ;;  %644 = vst [vmem:[%s302_s26] sm:$0xff] %v636_v60 }
 0x2a0   : > { %v643_v62 = vsel %vm641_vm7, %v642_v59, %v640_v61 }
 0x2a1   : > { %645 = vst [vmem:[%s302_s26 + $0x8] sm:$0xff] %v643_v62 }
 0x2a2   : > { %1066 = shalt.err (!%p1063_p6)
}
 0x2a3   : > { %s1067_s30 = scalar_lea.hbm %s1326_s29, 256  ;;  %s1071_s21 = scalar_lea.hbm %s1380_s4, 512 }
 0x2a4   : > { %p1068_p7 = scmp.ne.s32.totalorder %s1326_s29, %s1067_s30  ;;  %p1072_p0 = scmp.lt.u32.totalorder %s1326_s29, %s1380_s4 }
 0x2a5   : > { %p1073_p1 = scmp.lt.u32.totalorder %s1071_s21, %s1067_s30  ;;  %p1075_p13 = scmp.lt.u32.totalorder %s1067_s30, %s1326_s29 }
 0x2a6   : > { %p1069_p9 = pnand %p1068_p7, %p1392_p8 }
 0x2a7   : > { %p1074_p4 = por %p1073_p1, %p1072_p0 }
 0x2a8   : > { %p1070_p12 = pneg %p1069_p9 }
 0x2a9   : > { %p1076_p10 = por %p1075_p13, %p1074_p4 }
 0x2ab   : > { %p1077_p11 = pnand %p1076_p10, %p1070_p12 }
 0x2ad   : > { %1080 = shalt.err (!%p1077_p11)
}
 0x2ae   : > { %s1152_s6 = smov 128   ;;  %s1153_s26 = smov 8  }
 0x2af   : > { %882 = dma.vmem_to_hbm [thread:$0]  (%p1392_p8), %s1328_s5, 256, %s1326_s29, %s1330_s18, %s1152_s6, %s1152_s6, %s1153_s26  }
 0x2b0 PF: > { %p899_p2 = scmp.ge.s32.totalorder %s1139_s20, 2  ;;  %s677_s8 = sand.u32 1, %s1119_s15  }
 0x2b1   : > { %p1393_p3 = scmp.ne.s32.totalorder %s1386_s27, 0  ;;  %s678_s10 = scalar_lea.sflag [#allocation5], %s677_s8 }
 0x2b3   : > { %p892_p5 = pnand %p899_p2, %p1393_p3 }
 0x2b5   : > { %1114 = dma.done.wait (!%p892_p5), %s678_s10, 256  }
 0x2b6   : > { %1116 = vsyncadd (!%p892_p5), %s678_s10, 4294967040  ;;  %s19_s20 = sadd.s32 1, %s1139_s20   ;;  %s1394_s15 = smov %s1123_s16 }
 0x2b7   : > { %p16_p6 = scmp.ge.s32.totalorder %s19_s20, 4   ;;  %s1395_s16 = smov %s1127_s17 }
 0x2b8   : > { %s1396_s17 = smov %s1232_s28  ;;  %s1397_s18 = smov %s1135_s19 }
 0x2b9   : > { %s1398_s19 = smov %s1400_s23  ;;  %18 = sbr.rel (!%p16_p6) target bundleno = 6 (0x6), region = 93 }
 0x2c0   :  { %683 = vsyncpa [#allocation4], 1 }
 0x2c1   :  { %685 = vsyncpa [#allocation4 + $0x1], 1 }
 0x2c2   :  { %686 = vsyncpa [#allocation7], 1 }
 0x2c3   :  { %687 = vsyncpa [#allocation5], 1 }
 0x2c4   :  { %689 = vsyncpa [#allocation5 + $0x1], 1 }

</bundles_post_ra>
